<compile_context>
chip_gen: v7x
topology: tpu7x:2x2x1
jax: 0.10.0
libtpu: 0.0.40
codegen_flags: <defaults>
</compile_context>

<pallas_src>
import functools

import jax
import jax.numpy as jnp
from jax.experimental import pallas as pl
from jax.experimental.pallas import tpu as pltpu


def _logistic_kernel(x_ref, w_ref, b_ref, o_ref):
    # x_ref: [TB, in_pad]   w_ref: [in_pad, out_pad]   b_ref: [1, out_pad]
    logits = jax.lax.dot_general(
        x_ref[...],
        w_ref[...],
        dimension_numbers=(((1,), (0,)), ((), ())),   # plain MxK @ KxN -> native vmatmul
        preferred_element_type=jnp.float32,
    )
    logits = logits + b_ref[...].astype(jnp.float32)  # [1, out_pad] broadcasts

    # Numerically stable LogSoftmax over the feature axis, all in f32.
    m = jnp.max(logits, axis=-1, keepdims=True)
    shifted = logits - m
    lse = jnp.log(jnp.sum(jnp.exp(shifted), axis=-1, keepdims=True))
    o_ref[...] = (shifted - lse).astype(o_ref.dtype)


def _round_up(v, m):
    return ((v + m - 1) // m) * m


def _vmem_capacity_bytes():
    # Per-TensorCore physical VMEM; conservative fallback (v7x) if unavailable.
    try:
        return int(pltpu.get_tpu_info().vmem_capacity_bytes)
    except Exception:
        return 64 * 1024 * 1024


@functools.partial(jax.jit, static_argnames=("max_block_b", "use_bf16_matmul"))
def logistic_forward(x, weight, bias, *, max_block_b=2048, use_bf16_matmul=False):
    """x: [B, in_dim]; weight: [out_dim, in_dim] (PyTorch layout); bias: [out_dim]."""
    B, in_dim = x.shape
    out_dim = weight.shape[0]

    # --- Feature padding (lane-dense loads, MXU-aligned K and N). -------------
    in_pad = max(128, _round_up(in_dim, 128))
    out_pad = max(128, _round_up(out_dim, 256 if out_dim > 128 else 128))

    mxu_dtype = jnp.bfloat16 if use_bf16_matmul else x.dtype
    elt = jnp.dtype(mxu_dtype).itemsize
    out_elt = jnp.dtype(x.dtype).itemsize

    # Weight: transpose once host-side (under jit), pad with zeros along both dims.
    w_t = weight.T.astype(mxu_dtype)                                   # [in_dim, out_dim]
    w_p = jnp.pad(w_t, ((0, in_pad - in_dim), (0, out_pad - out_dim)))  # zero rows/cols
    # Bias: padded columns masked with -1e30 (f32-safe) so they never affect logsumexp.
    b_p = jnp.concatenate(
        [bias.astype(jnp.float32),
         jnp.full((out_pad - out_dim,), -1e30, dtype=jnp.float32)]).reshape(1, out_pad)

    # --- VMEM accounting ------------------------------------------------------
    vmem_cap = _vmem_capacity_bytes()
    vmem_limit = min((vmem_cap * 3) // 4, 112 * 1024 * 1024)   # ~96 MiB on v5e/v6e, 48 MiB on v7x
    budget = vmem_limit - (4 << 20)                            # headroom for internal scratch

    w_bytes = in_pad * out_pad * elt
    b_bytes = out_pad * 4

    # --- Batch tile: largest candidate whose full (double-buffered) footprint fits.
    # Weight/bias have constant index_maps (DMA'd once) but still occupy 2 buffers
    # under default pipelining, so they are charged twice as well.
    tb = 8
    for cand in (2048, 1024, 512, 256, 128, 64, 32, 16, 8):
        if cand > max_block_b:
            continue
        tile_bytes = 2 * cand * (in_pad * elt + out_pad * out_elt)   # x + out, double-buffered
        if tile_bytes + 2 * (w_bytes + b_bytes) <= budget:
            tb = cand
            break
    # TODO(synk): if 2*w_bytes alone exceeds the budget (vocab-sized out_dim), add an
    # "arbitrary" out_pad grid axis with an online logsumexp (running max/sum scratch)
    # instead of a fully VMEM-resident weight block.

    tb = min(tb, max(8, _round_up(B, 8)))          # never exceed the (padded) batch
    if B >= 1024:
        tb = min(tb, max(256, _round_up((B + 3) // 4, 256)))   # >=4 steps, 256-tall MXU tiles
    elif B > 8:
        tb = min(tb, max(8, _round_up((B + 1) // 2, 8)))        # >=2 steps (v7x megacore / pipeline)

    B_pad = _round_up(B, tb)
    x_c = x.astype(mxu_dtype) if use_bf16_matmul else x
    x_p = jnp.pad(x_c, ((0, B_pad - B), (0, in_pad - in_dim)))

    grid = (B_pad // tb,)

    cost = pl.CostEstimate(
        flops=2 * B_pad * in_pad * out_pad,
        transcendentals=B_pad * out_pad,
        bytes_accessed=(B_pad * in_pad * elt + in_pad * out_pad * elt
                        + out_pad * 4 + B_pad * out_pad * out_elt),
    )

    out_p = pl.pallas_call(
        _logistic_kernel,
        out_shape=jax.ShapeDtypeStruct((B_pad, out_pad), x.dtype),
        grid_spec=pltpu.PrefetchScalarGridSpec(
            num_scalar_prefetch=0,
            grid=grid,
            in_specs=[
                pl.BlockSpec((tb, in_pad), lambda i: (i, 0)),         # x tile (pipelined)
                pl.BlockSpec((in_pad, out_pad), lambda i: (0, 0)),    # weight (resident)
                pl.BlockSpec((1, out_pad), lambda i: (0, 0)),         # bias (resident)
            ],
            out_specs=pl.BlockSpec((tb, out_pad), lambda i: (i, 0)),  # lane-dense out tile
        ),
        compiler_params=pltpu.CompilerParams(
            dimension_semantics=("parallel",),
            vmem_limit_bytes=vmem_limit,
        ),
        cost_estimate=cost,
    )(x_p, w_p, b_p)

    return out_p[:B, :out_dim]


if __name__ == "__main__":
    key = jax.random.PRNGKey(0)
    k_x, k_w, k_b = jax.random.split(key, 3)

    B, in_dim, out_dim = 8, 32, 16

    x = jax.random.normal(k_x, (B, in_dim), dtype=jnp.float32)
    # Deterministic "nn.Linear"-style init (uniform in [-1/sqrt(in), 1/sqrt(in)]).
    bound = 1.0 / jnp.sqrt(jnp.float32(in_dim))
    weight = jax.random.uniform(k_w, (out_dim, in_dim), dtype=jnp.float32,
                                minval=-bound, maxval=bound)
    bias = jax.random.uniform(k_b, (out_dim,), dtype=jnp.float32,
                              minval=-bound, maxval=bound)

    out = logistic_forward(x, weight, bias)
    jax.block_until_ready(out)

    # Reference check in plain JAX.
    ref = jax.nn.log_softmax(x @ weight.T + bias, axis=1)
    assert out.shape == (B, out_dim)
    assert jnp.allclose(out, ref, atol=1e-5, rtol=1e-5)

    print("KERNEL_OK")
</pallas_src>

<mosaic_0001>
module attributes {stable_mosaic.version = 11 : i64} {
  func.func @_logistic_kernel(%arg0: i32, %arg1: memref<8x128xf32, #tpu.memory_space<vmem>>, %arg2: memref<128x128xf32, #tpu.memory_space<vmem>>, %arg3: memref<1x128xf32, #tpu.memory_space<vmem>>, %arg4: memref<8x128xf32, #tpu.memory_space<vmem>>) attributes {dimension_semantics = [#tpu.dimension_semantics<parallel>], iteration_bounds = array<i64: 1>, scalar_prefetch = 0 : i64, scratch_operands = 0 : i64, tpu.core_type = #tpu.core_type<tc>, window_params = [{transform_indices = @transform_0, window_bounds = array<i64: 8, 128>}, {pipeline_mode = #tpu.pipeline_mode<synchronous>, transform_indices = @transform_1, window_bounds = array<i64: 128, 128>}, {pipeline_mode = #tpu.pipeline_mode<synchronous>, transform_indices = @transform_2, window_bounds = array<i64: 1, 128>}, {transform_indices = @transform_3, window_bounds = array<i64: 8, 128>}]} {
    %c0 = arith.constant 0 : index
    %c0_0 = arith.constant 0 : index
    %0 = vector.load %arg1[%c0, %c0_0] : memref<8x128xf32, #tpu.memory_space<vmem>>, vector<8x128xf32>
    %c0_1 = arith.constant 0 : index
    %c0_2 = arith.constant 0 : index
    %1 = vector.load %arg2[%c0_1, %c0_2] : memref<128x128xf32, #tpu.memory_space<vmem>>, vector<128x128xf32>
    %cst = arith.constant dense<0.000000e+00> : vector<8x128xf32>
    %2 = tpu.matmul %0, %1, %cst {dimension_numbers = #tpu.dot_dimension_numbers<[1], [0], [0], [1], [0, 0, 1, 1], [], []>} : vector<8x128xf32>, vector<128x128xf32>, vector<8x128xf32> -> vector<8x128xf32>
    %c0_3 = arith.constant 0 : index
    %c0_4 = arith.constant 0 : index
    %3 = vector.load %arg3[%c0_3, %c0_4] : memref<1x128xf32, #tpu.memory_space<vmem>>, vector<1x128xf32>
    %4 = vector.broadcast %3 : vector<1x128xf32> to vector<8x128xf32>
    %5 = arith.addf %2, %4 : vector<8x128xf32>
    %cst_5 = arith.constant dense<0xFF800000> : vector<8xf32>
    %6 = vector.multi_reduction <maximumf>, %5, %cst_5 [1] : vector<8x128xf32> to vector<8xf32>
    %7 = vector.shape_cast %6 : vector<8xf32> to vector<8x1xf32>
    %8 = vector.broadcast %7 : vector<8x1xf32> to vector<8x128xf32>
    %9 = arith.subf %5, %8 : vector<8x128xf32>
    %10 = math.exp %9 : vector<8x128xf32>
    %cst_6 = arith.constant dense<0.000000e+00> : vector<8xf32>
    %11 = vector.multi_reduction <add>, %10, %cst_6 [1] : vector<8x128xf32> to vector<8xf32>
    %12 = vector.shape_cast %11 : vector<8xf32> to vector<8x1xf32>
    %13 = math.log %12 : vector<8x1xf32>
    %14 = vector.broadcast %13 : vector<8x1xf32> to vector<8x128xf32>
    %15 = arith.subf %9, %14 : vector<8x128xf32>
    %c0_7 = arith.constant 0 : index
    %c0_8 = arith.constant 0 : index
    %16 = vector.load %arg4[%c0_7, %c0_8] : memref<8x128xf32, #tpu.memory_space<vmem>>, vector<8x128xf32>
    tpu.vector_store %arg4[%c0_7, %c0_8], %15 {strides = array<i32>} : memref<8x128xf32, #tpu.memory_space<vmem>>, vector<8x128xf32>,
    return
  }
  func.func @transform_0(%arg0: i32) -> (i32, i32) {
    %c0_i32 = arith.constant 0 : i32
    %c0_i32_0 = arith.constant 0 : i32
    return %arg0, %c0_i32 : i32, i32
  }
  func.func @transform_1(%arg0: i32) -> (i32, i32) {
    %c0_i32 = arith.constant 0 : i32
    %c0_i32_0 = arith.constant 0 : i32
    %c0_i32_1 = arith.constant 0 : i32
    return %c0_i32, %c0_i32_0 : i32, i32
  }
  func.func @transform_2(%arg0: i32) -> (i32, i32) {
    %c0_i32 = arith.constant 0 : i32
    %c0_i32_0 = arith.constant 0 : i32
    %c0_i32_1 = arith.constant 0 : i32
    return %c0_i32, %c0_i32_0 : i32, i32
  }
  func.func @transform_3(%arg0: i32) -> (i32, i32) {
    %c0_i32 = arith.constant 0 : i32
    %c0_i32_0 = arith.constant 0 : i32
    return %arg0, %c0_i32 : i32, i32
  }
}

</mosaic_0001>

<bundles_post_ra>
// kernel: logistic_forward.1
= control target key start
LH: loop header
LB: loop body
LE: loop exit
PB: predicated region body
PF: predicated region fallthrough
CT: control target
= control target key end

     0   :  { %v243_v3 = vmov 0.0|0.0   ;;  %vm244_vm0 = vmmov 0   ;;  %v245_v6 = vmov 0.0   ;;  %s333_s0 = inlined_call_operand.vmem [shape: f32[8,128], index: 0, kind: input, shape index: {}]   ;;  %s334_s1 = inlined_call_operand.vmem [shape: f32[128,128], index: 1, kind: input, shape index: {}]   ;;  %s335_s2 = inlined_call_operand.vmem [shape: f32[1,128], index: 2, kind: input, shape index: {}]   ;;  %s336_s3 = inlined_call_operand.hbm [shape: f32[8,128], index: 3, kind: output, shape index: {}]  }
   0x1   :  { %v16_v0 = vld [vmem:[%s334_s1] sm:$0xff]  ;;  %v17_v1 = vld [vmem:[%s334_s1 + $0x8] sm:$0xff]  ;;  %v18_v2 = vld [vmem:[%s334_s1 + $0x10] sm:$0xff]  ;;  %187 = vmatprep.subr.bf16.mxu0 %v243_v3  ;;  %184 = vmatprep.mubr.msk.f32.mxu0 %vm244_vm0, %v245_v6 }
   0x2   :  { %v188_v4 = vpack.c.bf16 %v17_v1, %v16_v0  ;;  %v19_v5 = vld [vmem:[%s334_s1 + $0x18] sm:$0xff]  ;;  %v20_v8 = vld [vmem:[%s334_s1 + $0x20] sm:$0xff]  ;;  %v21_v9 = vld [vmem:[%s334_s1 + $0x28] sm:$0xff] }
   0x3   :  { %v191_v7 = vpack.c.bf16 %v19_v5, %v18_v2 }
   0x4   :  { %189 = vmatpush3.bf16.msra.mxu0 %v188_v4 }
   0x5   :  { %190 = vmatprep.subr.bf16.mxu0 %v243_v3 }
   0x6   :  { %8 = vsyncpa [#allocation3], 0  ;;  %v194_v10 = vpack.c.bf16 %v21_v9, %v20_v8  ;;  %v22_v11 = vld [vmem:[%s334_s1 + $0x30] sm:$0xff]  ;;  %v23_v12 = vld [vmem:[%s334_s1 + $0x38] sm:$0xff] }
   0x7   :  { %v197_v13 = vpack.c.bf16 %v23_v12, %v22_v11  ;;  %v24_v14 = vld [vmem:[%s334_s1 + $0x40] sm:$0xff]  ;;  %v25_v15 = vld [vmem:[%s334_s1 + $0x48] sm:$0xff]  ;;  %v26_v17 = vld [vmem:[%s334_s1 + $0x50] sm:$0xff] }
   0x8   :  { %192 = vmatpush3.bf16.msra.mxu0 %v191_v7  ;;  %v200_v16 = vpack.c.bf16 %v25_v15, %v24_v14  ;;  %v27_v18 = vld [vmem:[%s334_s1 + $0x58] sm:$0xff]  ;;  %v28_v20 = vld [vmem:[%s334_s1 + $0x60] sm:$0xff]  ;;  %v29_v21 = vld [vmem:[%s334_s1 + $0x68] sm:$0xff] }
   0x9   :  { %193 = vmatprep.subr.bf16.mxu0 %v243_v3  ;;  %v203_v19 = vpack.c.bf16 %v27_v18, %v26_v17  ;;  %v206_v22 = vpack.c.bf16 %v29_v21, %v28_v20  ;;  %v30_v23 = vld [vmem:[%s334_s1 + $0x70] sm:$0xff]  ;;  %v31_v24 = vld [vmem:[%s334_s1 + $0x78] sm:$0xff]  ;;  %v15_v26 = vld [vmem:[%s333_s0] sm:$0xff]  ;;  %s246_s1 = smov [#allocation2]  }
   0xa   :  { %v209_v25 = vpack.c.bf16 %v31_v24, %v30_v23  ;;  %v134_v27 = vld [vmem:[%s335_s2] ss:$0 sm:$0xff]  ;;  %s126_s0 = sshll.u32 %s246_s1, 4  ;;  %s127_s0 = int_to_ptr.vmem [resolvable:$true] %s126_s0 }
   0xb   :  { %s219_s2 = scalar_lea.vmem %s127_s0, 128  ;;  %p224_p1 = scmp.lt.s32.totalorder %s127_s0, %s127_s0 }
   0xc   :  { %195 = vmatpush3.bf16.msra.mxu0 %v194_v10  ;;  %p220_p0 = scmp.ne.s32.totalorder %s127_s0, %s219_s2  ;;  %p225_p2 = scmp.lt.s32.totalorder %s219_s2, %s219_s2 }
   0xd   :  { %196 = vmatprep.subr.bf16.mxu0 %v243_v3 }
   0xe   :  { %p226_p3 = por %p225_p2, %p224_p1 }
  0x10   :  { %198 = vmatpush3.bf16.msra.mxu0 %v197_v13  ;;  %p227_p4 = pnand %p226_p3, %p220_p0 }
  0x11   :  { %199 = vmatprep.subr.bf16.mxu0 %v243_v3 }
  0x14   :  { %201 = vmatpush3.bf16.msra.mxu0 %v200_v16 }
  0x15   :  { %202 = vmatprep.subr.bf16.mxu0 %v243_v3 }
  0x18   :  { %204 = vmatpush3.bf16.msra.mxu0 %v203_v19 }
  0x19   :  { %205 = vmatprep.subr.bf16.mxu0 %v243_v3 }
  0x1c   :  { %207 = vmatpush3.bf16.msra.mxu0 %v206_v22 }
  0x1d   :  { %208 = vmatprep.subr.bf16.mxu0 %v243_v3 }
  0x20   :  { %210 = vmatpush3.bf16.msra.mxu0 %v209_v25 }
  0x23   :  { %185 = vmatmul.mubr.f32.vlgmr.msra.gmra.mrb[0].mxu0 %v15_v26 }
  0xf6   :  { %v105_v28 = vpop.f32.mrb[0].mxu0 }
  0xf7   :  { %v106_v29 = vadd.f32 %v134_v27, %v105_v28  ;;  %v186_v30 = vpop.f32.mrb[1].mxu0 }
  0xf9   :  { %109 = vmax.xlane.f32.xlu0 %v106_v29 }
 0x186   :  { %v110_v31 = vpop.xlane.xlu0 %109 }
 0x187   :  { %v111_v32 = vsub.f32 %v106_v29, %v110_v31 }
 0x189   :  { %v112_v33 = vmul.f32 1.442695, %v111_v32 }
 0x18b   :  { %215 = vpow2.f32 %v112_v33 }
 0x195   :  { %v216_v34 = vpop.eup %215 }
 0x196   :  { %114 = vadd.xlane.f32.xlu0 %v216_v34 }
 0x223   :  { %v115_v35 = vpop.xlane.xlu0 %114 }
 0x224   :  { %217 = vlog2.f32 %v115_v35 }
 0x22e   :  { %v218_v36 = vpop.eup %217 }
 0x22f   :  { %v117_v37 = vmul.f32 0.6931472, %v218_v36 }
 0x231   :  { %v118_v38 = vsub.f32 %v111_v32, %v117_v37 }
 0x233   :  { %119 = vst [vmem:[#allocation2] sm:$0xff] %v118_v38 }
 0x234   :  { %230 = shalt.err (!%p227_p4)
}
 0x235   :  { %s231_s23 = scalar_lea.hbm %s336_s3, 128 }
 0x236   :  { %p232_p5 = scmp.ne.s32.totalorder %s336_s3, %s231_s23  ;;  %p235_p6 = scmp.lt.u32.totalorder %s231_s23, %s336_s3 }
 0x238   :  { %p237_p7 = pnand %p235_p6, %p232_p5 }
 0x23a   :  { %240 = shalt.err (!%p237_p7)
}
 0x23b   :  { %129 = dma.vmem_to_hbm [thread:$0]  %s127_s0, 128, %s336_s3, [#allocation3]  }
 0x23c   :  { %241 = dma.done.wait [#allocation3], 128  }
 0x23d   :  { %242 = vsyncadd [#allocation3], 4294967168 }
 0x23e   :  { %133 = vsyncpa [#allocation3], 1 }

</bundles_post_ra>
